<compile_context>
chip_gen: v6e
topology: v6e:2x2x1
jax: 0.10.0
libtpu: 0.0.40
codegen_flags: <defaults>
</compile_context>

<pallas_src>
import functools

import jax
import jax.numpy as jnp
from jax import lax
from jax.experimental import pallas as pl
from jax.experimental.pallas import tpu as pltpu


def _addnorm_ff_kernel(x_ref, g_ref, bta_ref, w1_ref, b1_ref, w2_ref, b2_ref,
                       o_ref, ln_ref, *acc_scratch, eps):
    j = pl.program_id(1)
    # When the output dtype is f32 we accumulate straight into the resident
    # output block and skip the separate f32 scratch (VMEM headroom on v7x).
    acc_ref = acc_scratch[0] if acc_scratch else o_ref
    cdt = ln_ref.dtype  # compute (MXU) dtype, e.g. bfloat16

    @pl.when(j == 0)
    def _():
        # LayerNorm statistics from the un-rounded input tile (f32 math).
        x = x_ref[...].astype(jnp.float32)
        mean = jnp.mean(x, axis=-1, keepdims=True)
        xc = x - mean
        var = jnp.mean(xc * xc, axis=-1, keepdims=True)
        inv = lax.rsqrt(var + eps)
        ln = xc * inv * g_ref[...] + bta_ref[...]
        ln_ref[...] = ln.astype(cdt)

    # First FF matmul: ln [tm, E] x W1-tile [th, E], contracting E with E
    # (rhs-transposed matmul is native on the MXU; keeps W1's HBM tile
    #  row-contiguous).  Weight tiles are cast in-kernel only if they were not
    # already stored in the compute dtype (trace-time no-op otherwise).
    w1 = w1_ref[...]
    if w1.dtype != cdt:
        w1 = w1.astype(cdt)
    h = lax.dot_general(ln_ref[...], w1,
                        dimension_numbers=(((1,), (1,)), ((), ())),
                        preferred_element_type=jnp.float32)
    h = jnp.maximum(h + b1_ref[...], 0.0)

    # Second FF matmul: contract over this hidden tile, accumulate in f32.
    w2 = w2_ref[...]
    if w2.dtype != cdt:
        w2 = w2.astype(cdt)
    upd = jnp.dot(h.astype(cdt), w2, preferred_element_type=jnp.float32)

    @pl.when(j == 0)
    def _():
        # Residual + second-layer bias folded into the FIRST accumulate
        # (removes an init store followed by a load+store on every row tile).
        acc_ref[...] = x_ref[...].astype(jnp.float32) + b2_ref[...] + upd

    @pl.when(j != 0)
    def _():
        acc_ref[...] += upd

    if acc_scratch:  # separate accumulator -> cast/store once at the last j
        @pl.when(j == pl.num_programs(1) - 1)
        def _():
            o_ref[...] = acc_ref[...].astype(o_ref.dtype)


def _pick_tile(dim, preferred, aligns):
    """Largest multiple of one of `aligns` (tried in order) that divides `dim`
    and is <= `preferred`; falls back to the full dimension (always legal)."""
    for align in aligns:
        t = (min(preferred, dim) // align) * align
        while t >= align:
            if dim % t == 0:
                return t
            t -= align
    return dim


def _vmem_capacity_bytes():
    try:
        return int(pltpu.get_tpu_info().vmem_capacity_bytes)
    except Exception:
        return 64 * 1024 * 1024  # conservative: v7x per-TensorCore VMEM


@functools.partial(jax.jit,
                   static_argnames=("eps", "tm", "th", "compute_dtype"))
def addnorm_ff(x, gamma, beta, w1, b1, w2_t, b2, *, eps=1e-5,
               tm=None, th=None, compute_dtype=jnp.bfloat16):
    """y = x + FF(LayerNorm(x)),  FF(z) = relu(z @ w1.T + b1) @ w2_t + b2.

    x     : [B, S, E]  (kept in its own dtype; residual & LN stats stay f32)
    gamma : [E]        LayerNorm weight
    beta  : [E]        LayerNorm bias
    w1    : [H, E]     PyTorch nn.Linear(E, H).weight layout (row-contiguous tiles)
    b1    : [H]
    w2_t  : [H, E]     transpose of nn.Linear(H, E).weight
    b2    : [E]
    Weights are best stored in `compute_dtype` (bf16); they are cast per tile
    in-kernel only if they arrive in another dtype (no per-call wrapper cast).
    Returns [B, S, E] in x.dtype.
    """
    B, S, E = x.shape
    H, E1 = w1.shape
    H2, E2 = w2_t.shape
    assert E == E1 == E2 and H == H2
    M = B * S

    xb = jnp.dtype(x.dtype).itemsize
    wb = jnp.dtype(w1.dtype).itemsize
    cb = jnp.dtype(compute_dtype).itemsize
    ob = xb
    acc_in_out = jnp.dtype(x.dtype) == jnp.float32

    vmem_cap = _vmem_capacity_bytes()
    big_vmem = vmem_cap >= 96 * 1024 * 1024  # v5e / v6e class (128 MiB VMEM)

    # Hidden tile: 256-aligned (fills the 2x256x256 MXU on v6e/v7x; a fine
    # multiple for v5e's 4x128x128 too).  On 128 MiB-VMEM chips make the FF
    # weights VMEM-resident (th = H -> constant weight block index, weights
    # DMA'd from HBM exactly once) whenever they fit comfortably.
    if th is None:
        weights_fit = 2 * (2 * E * H) * wb <= vmem_cap // 2 - (8 << 20)
        th = H if (big_vmem and weights_fit) else _pick_tile(H, 512, (256, 128))
    weights_resident = (th == H)

    # Row tile: every non-resident pass re-streams all of W1/W2, so tm sets the
    # arithmetic intensity (~tm FLOP/byte).  v6e/v7x need ~650+ FLOP/B to stay
    # MXU-bound -> prefer ~1024 rows when streaming; 512 is plenty when the
    # weights are resident (or on v5e's ~240 FLOP/B knee).
    if tm is None:
        tm = _pick_tile(M, 512 if weights_resident else 1024, (16, 8))
        # v7x-class chips: 2 TensorCores -> make sure the "parallel" grid axis
        # has at least 2 row tiles so both cores get work.
        if (not big_vmem) and M // tm == 1 and M >= 16:
            tm = _pick_tile(M, M // 2, (16, 8))

    def _vmem_need(tm_, th_):
        return (2 * tm_ * E * xb                 # x tile (double-buffered)
                + 2 * tm_ * E * ob               # output tile
                + 2 * 2 * E * th_ * wb           # W1 + W2 tiles
                + 2 * (3 * E + 2 * th_) * 4      # gamma/beta/b1/b2 tiles
                + tm_ * E * cb                   # LayerNorm scratch
                + (0 if acc_in_out else tm_ * E * 4))  # f32 accumulator

    # VMEM budget: leave headroom for Mosaic internals.  Never ask for the
    # full 64 MiB on v7x; allow up to ~112 MiB on the 128 MiB chips.
    budget = (min(112 << 20, vmem_cap - (16 << 20)) if big_vmem
              else min(52 << 20, max(vmem_cap - (12 << 20), 32 << 20)))
    while _vmem_need(tm, th) > budget:
        new_tm = _pick_tile(M, max(8, tm // 2), (16, 8))
        if new_tm >= tm:
            break
        tm = new_tm
    vmem_limit = int(max(32 << 20, min(budget, _vmem_need(tm, th) + (8 << 20))))

    assert M % tm == 0 and H % th == 0

    # No dtype cast of x / weights here: keep residual & LN numerics in the
    # input dtype and avoid an extra un-hidden HBM pass per call.
    x2d = x.reshape(M, E)
    g2d = gamma.reshape(1, E).astype(jnp.float32)
    bt2d = beta.reshape(1, E).astype(jnp.float32)
    b1_2d = b1.reshape(1, H).astype(jnp.float32)
    b2_2d = b2.reshape(1, E).astype(jnp.float32)

    weight_passes = 1 if weights_resident else (M // tm)
    cost = pl.CostEstimate(
        flops=4 * M * E * H,                 # two matmuls
        transcendentals=M,                   # one rsqrt per row
        bytes_accessed=int(M * E * xb + M * E * ob
                           + weight_passes * (2 * E * H) * wb
                           + (3 * E + 2 * H) * 4),
    )

    scratch_shapes = [pltpu.VMEM((tm, E), compute_dtype)]   # LayerNorm(x) tile
    if not acc_in_out:
        scratch_shapes.append(pltpu.VMEM((tm, E), jnp.float32))  # f32 acc

    out = pl.pallas_call(
        functools.partial(_addnorm_ff_kernel, eps=eps),
        out_shape=jax.ShapeDtypeStruct((M, E), x.dtype),
        grid_spec=pltpu.PrefetchScalarGridSpec(
            num_scalar_prefetch=0,
            grid=(M // tm, H // th),
            in_specs=[
                pl.BlockSpec((tm, E), lambda i, j: (i, 0)),   # x row tile
                pl.BlockSpec((1, E), lambda i, j: (0, 0)),    # gamma
                pl.BlockSpec((1, E), lambda i, j: (0, 0)),    # beta
                pl.BlockSpec((th, E), lambda i, j: (j, 0)),   # W1 row tile [H,E]
                pl.BlockSpec((1, th), lambda i, j: (0, j)),   # b1 tile
                pl.BlockSpec((th, E), lambda i, j: (j, 0)),   # W2^T row tile
                pl.BlockSpec((1, E), lambda i, j: (0, 0)),    # b2
            ],
            out_specs=pl.BlockSpec((tm, E), lambda i, j: (i, 0)),
            scratch_shapes=scratch_shapes,
        ),
        compiler_params=pltpu.CompilerParams(
            dimension_semantics=("parallel", "arbitrary"),
            vmem_limit_bytes=vmem_limit,
        ),
        cost_estimate=cost,
    )(x2d, g2d, bt2d, w1, b1_2d, w2_t, b2_2d)

    return out.reshape(B, S, E)


if __name__ == "__main__":
    batch, seq, emb_size, ff_size = 2, 8, 32, 128
    # TODO(synk): training-mode nn.Dropout (stochastic masking) is not implemented;
    # this kernel matches eval-mode forward where dropout is the identity.

    key = jax.random.PRNGKey(0)
    kx, kg, kb, kw1, kb1, kw2, kb2 = jax.random.split(key, 7)

    x = jax.random.normal(kx, (batch, seq, emb_size), dtype=jnp.float32)

    # LayerNorm params (perturbed from gamma=1, beta=0 so the check exercises them).
    gamma = 1.0 + 0.1 * jax.random.normal(kg, (emb_size,), dtype=jnp.float32)
    beta = 0.1 * jax.random.normal(kb, (emb_size,), dtype=jnp.float32)

    # Feed-forward params, nn.Linear-style U(-1/sqrt(fan_in), 1/sqrt(fan_in)).
    bd1 = 1.0 / (emb_size ** 0.5)
    w1 = jax.random.uniform(kw1, (ff_size, emb_size), minval=-bd1, maxval=bd1,
                            dtype=jnp.float32)
    b1 = jax.random.uniform(kb1, (ff_size,), minval=-bd1, maxval=bd1,
                            dtype=jnp.float32)
    bd2 = 1.0 / (ff_size ** 0.5)
    w2 = jax.random.uniform(kw2, (emb_size, ff_size), minval=-bd2, maxval=bd2,
                            dtype=jnp.float32)
    b2 = jax.random.uniform(kb2, (emb_size,), minval=-bd2, maxval=bd2,
                            dtype=jnp.float32)

    # "Stored-in-bf16" weights: converted ONCE here (not per call in the wrapper).
    w1_bf16 = w1.astype(jnp.bfloat16)        # PyTorch nn.Linear(E,H).weight layout [H, E]
    w2_t_bf16 = w2.T.astype(jnp.bfloat16)    # [H, E]

    y = addnorm_ff(x, gamma, beta, w1_bf16, b1, w2_t_bf16, b2)
    jax.block_until_ready(y)

    # Pure-JAX f32 reference: x + FF(LayerNorm(x)), dropout in eval mode.
    mean = x.mean(-1, keepdims=True)
    var = ((x - mean) ** 2).mean(-1, keepdims=True)
    ln = (x - mean) / jnp.sqrt(var + 1e-5) * gamma + beta
    h = jnp.maximum(ln @ w1.T + b1, 0.0)
    y_ref = x + (h @ w2.T + b2)

    assert y.shape == (batch, seq, emb_size)
    assert y.dtype == x.dtype
    assert jnp.allclose(y, y_ref, atol=3e-2, rtol=3e-2), (
        "mismatch vs reference: max abs err "
        f"{jnp.max(jnp.abs(y - y_ref)):.4e}")

    # Also exercise the separate-f32-accumulator path (non-f32 activations).
    xb = x.astype(jnp.bfloat16)
    yb = addnorm_ff(xb, gamma, beta, w1_bf16, b1, w2_t_bf16, b2)
    jax.block_until_ready(yb)
    xb32 = xb.astype(jnp.float32)
    mean_b = xb32.mean(-1, keepdims=True)
    var_b = ((xb32 - mean_b) ** 2).mean(-1, keepdims=True)
    ln_b = (xb32 - mean_b) / jnp.sqrt(var_b + 1e-5) * gamma + beta
    h_b = jnp.maximum(ln_b @ w1.T + b1, 0.0)
    yb_ref = xb32 + (h_b @ w2.T + b2)
    assert yb.dtype == jnp.bfloat16
    assert jnp.allclose(yb.astype(jnp.float32), yb_ref, atol=6e-2, rtol=6e-2), (
        "bf16-path mismatch: max abs err "
        f"{jnp.max(jnp.abs(yb.astype(jnp.float32) - yb_ref)):.4e}")

    print("KERNEL_OK")
</pallas_src>

<mosaic_0001>
module attributes {stable_mosaic.version = 11 : i64} {
  func.func @_addnorm_ff_kernel(%arg0: i32, %arg1: i32, %arg2: memref<8x32xf32, #tpu.memory_space<vmem>>, %arg3: memref<1x32xf32, #tpu.memory_space<vmem>>, %arg4: memref<1x32xf32, #tpu.memory_space<vmem>>, %arg5: memref<128x32xbf16, #tpu.memory_space<vmem>>, %arg6: memref<1x128xf32, #tpu.memory_space<vmem>>, %arg7: memref<128x32xbf16, #tpu.memory_space<vmem>>, %arg8: memref<1x32xf32, #tpu.memory_space<vmem>>, %arg9: memref<8x32xf32, #tpu.memory_space<vmem>>, %arg10: memref<8x32xbf16, #tpu.memory_space<vmem>>) attributes {dimension_semantics = [#tpu.dimension_semantics<parallel>, #tpu.dimension_semantics<arbitrary>], iteration_bounds = array<i64: 2, 1>, scalar_prefetch = 0 : i64, scratch_operands = 1 : i64, tpu.core_type = #tpu.core_type<tc>, window_params = [{transform_indices = @transform_0, window_bounds = array<i64: 8, 32>}, {pipeline_mode = #tpu.pipeline_mode<synchronous>, transform_indices = @transform_1, window_bounds = array<i64: 1, 32>}, {pipeline_mode = #tpu.pipeline_mode<synchronous>, transform_indices = @transform_2, window_bounds = array<i64: 1, 32>}, {transform_indices = @transform_3, window_bounds = array<i64: 128, 32>}, {transform_indices = @transform_4, window_bounds = array<i64: 1, 128>}, {transform_indices = @transform_5, window_bounds = array<i64: 128, 32>}, {pipeline_mode = #tpu.pipeline_mode<synchronous>, transform_indices = @transform_6, window_bounds = array<i64: 1, 32>}, {transform_indices = @transform_7, window_bounds = array<i64: 8, 32>}]} {
    %c0_i32 = arith.constant 0 : i32
    %0 = arith.cmpi eq, %arg1, %c0_i32 : i32
    %1 = arith.extui %0 : i1 to i32
    %c0_i32_0 = arith.constant 0 : i32
    %2 = arith.cmpi ne, %1, %c0_i32_0 : i32
    scf.if %2 {
      %c0_14 = arith.constant 0 : index
      %c0_15 = arith.constant 0 : index
      %20 = vector.load %arg2[%c0_14, %c0_15] : memref<8x32xf32, #tpu.memory_space<vmem>>, vector<8x32xf32>
      %cst_16 = arith.constant dense<0.000000e+00> : vector<8xf32>
      %21 = vector.multi_reduction <add>, %20, %cst_16 [1] : vector<8x32xf32> to vector<8xf32>
      %22 = vector.shape_cast %21 : vector<8xf32> to vector<8x1xf32>
      %cst_17 = arith.constant 3.200000e+01 : f32
      %23 = vector.broadcast %cst_17 : f32 to vector<8x1xf32>
      %24 = arith.divf %22, %23 : vector<8x1xf32>
      %25 = vector.broadcast %24 : vector<8x1xf32> to vector<8x32xf32>
      %26 = arith.subf %20, %25 : vector<8x32xf32>
      %27 = arith.mulf %26, %26 : vector<8x32xf32>
      %cst_18 = arith.constant dense<0.000000e+00> : vector<8xf32>
      %28 = vector.multi_reduction <add>, %27, %cst_18 [1] : vector<8x32xf32> to vector<8xf32>
      %29 = vector.shape_cast %28 : vector<8xf32> to vector<8x1xf32>
      %cst_19 = arith.constant 3.200000e+01 : f32
      %30 = vector.broadcast %cst_19 : f32 to vector<8x1xf32>
      %31 = arith.divf %29, %30 : vector<8x1xf32>
      %cst_20 = arith.constant 9.99999974E-6 : f32
      %32 = vector.broadcast %cst_20 : f32 to vector<8x1xf32>
      %33 = arith.addf %31, %32 : vector<8x1xf32>
      %34 = math.rsqrt %33 : vector<8x1xf32>
      %35 = vector.broadcast %34 : vector<8x1xf32> to vector<8x32xf32>
      %36 = arith.mulf %26, %35 : vector<8x32xf32>
      %c0_21 = arith.constant 0 : index
      %c0_22 = arith.constant 0 : index
      %37 = vector.load %arg3[%c0_21, %c0_22] : memref<1x32xf32, #tpu.memory_space<vmem>>, vector<1x32xf32>
      %38 = vector.broadcast %37 : vector<1x32xf32> to vector<8x32xf32>
      %39 = arith.mulf %36, %38 : vector<8x32xf32>
      %c0_23 = arith.constant 0 : index
      %c0_24 = arith.constant 0 : index
      %40 = vector.load %arg4[%c0_23, %c0_24] : memref<1x32xf32, #tpu.memory_space<vmem>>, vector<1x32xf32>
      %41 = vector.broadcast %40 : vector<1x32xf32> to vector<8x32xf32>
      %42 = arith.addf %39, %41 : vector<8x32xf32>
      %43 = arith.truncf %42 : vector<8x32xf32> to vector<8x32xbf16>
      %c0_25 = arith.constant 0 : index
      %c0_26 = arith.constant 0 : index
      %44 = vector.load %arg10[%c0_25, %c0_26] : memref<8x32xbf16, #tpu.memory_space<vmem>>, vector<8x32xbf16>
      tpu.vector_store %arg10[%c0_25, %c0_26], %43 {strides = array<i32>} : memref<8x32xbf16, #tpu.memory_space<vmem>>, vector<8x32xbf16>,
    } else {
    }
    %c0 = arith.constant 0 : index
    %c0_1 = arith.constant 0 : index
    %3 = vector.load %arg5[%c0, %c0_1] : memref<128x32xbf16, #tpu.memory_space<vmem>>, vector<128x32xbf16>
    %c0_2 = arith.constant 0 : index
    %c0_3 = arith.constant 0 : index
    %4 = vector.load %arg10[%c0_2, %c0_3] : memref<8x32xbf16, #tpu.memory_space<vmem>>, vector<8x32xbf16>
    %cst = arith.constant dense<0.000000e+00> : vector<8x128xf32>
    %5 = tpu.matmul %4, %3, %cst {dimension_numbers = #tpu.dot_dimension_numbers<[1], [1], [0], [0], [0, 0, 1, 0], [], []>} : vector<8x32xbf16>, vector<128x32xbf16>, vector<8x128xf32> -> vector<8x128xf32>
    %c0_4 = arith.constant 0 : index
    %c0_5 = arith.constant 0 : index
    %6 = vector.load %arg6[%c0_4, %c0_5] : memref<1x128xf32, #tpu.memory_space<vmem>>, vector<1x128xf32>
    %7 = vector.broadcast %6 : vector<1x128xf32> to vector<8x128xf32>
    %8 = arith.addf %5, %7 : vector<8x128xf32>
    %cst_6 = arith.constant 0.000000e+00 : f32
    %9 = vector.broadcast %cst_6 : f32 to vector<8x128xf32>
    %10 = arith.maximumf %8, %9 : vector<8x128xf32>
    %c0_7 = arith.constant 0 : index
    %c0_8 = arith.constant 0 : index
    %11 = vector.load %arg7[%c0_7, %c0_8] : memref<128x32xbf16, #tpu.memory_space<vmem>>, vector<128x32xbf16>
    %12 = arith.truncf %10 : vector<8x128xf32> to vector<8x128xbf16>
    %cst_9 = arith.constant dense<0.000000e+00> : vector<8x32xf32>
    %13 = tpu.matmul %12, %11, %cst_9 {dimension_numbers = #tpu.dot_dimension_numbers<[1], [0], [0], [1], [0, 0, 1, 1], [], []>} : vector<8x128xbf16>, vector<128x32xbf16>, vector<8x32xf32> -> vector<8x32xf32>
    %c0_i32_10 = arith.constant 0 : i32
    %14 = arith.cmpi eq, %arg1, %c0_i32_10 : i32
    %15 = arith.extui %14 : i1 to i32
    %c0_i32_11 = arith.constant 0 : i32
    %16 = arith.cmpi ne, %15, %c0_i32_11 : i32
    scf.if %16 {
      %c0_14 = arith.constant 0 : index
      %c0_15 = arith.constant 0 : index
      %20 = vector.load %arg2[%c0_14, %c0_15] : memref<8x32xf32, #tpu.memory_space<vmem>>, vector<8x32xf32>
      %c0_16 = arith.constant 0 : index
      %c0_17 = arith.constant 0 : index
      %21 = vector.load %arg8[%c0_16, %c0_17] : memref<1x32xf32, #tpu.memory_space<vmem>>, vector<1x32xf32>
      %22 = vector.broadcast %21 : vector<1x32xf32> to vector<8x32xf32>
      %23 = arith.addf %20, %22 : vector<8x32xf32>
      %24 = arith.addf %23, %13 : vector<8x32xf32>
      %c0_18 = arith.constant 0 : index
      %c0_19 = arith.constant 0 : index
      %25 = vector.load %arg9[%c0_18, %c0_19] : memref<8x32xf32, #tpu.memory_space<vmem>>, vector<8x32xf32>
      tpu.vector_store %arg9[%c0_18, %c0_19], %24 {strides = array<i32>} : memref<8x32xf32, #tpu.memory_space<vmem>>, vector<8x32xf32>,
    } else {
    }
    %c0_i32_12 = arith.constant 0 : i32
    %17 = arith.cmpi ne, %arg1, %c0_i32_12 : i32
    %18 = arith.extui %17 : i1 to i32
    %c0_i32_13 = arith.constant 0 : i32
    %19 = arith.cmpi ne, %18, %c0_i32_13 : i32
    scf.if %19 {
      %c0_14 = arith.constant 0 : index
      %c0_15 = arith.constant 0 : index
      %20 = vector.load %arg9[%c0_14, %c0_15] : memref<8x32xf32, #tpu.memory_space<vmem>>, vector<8x32xf32>
      %21 = arith.addf %20, %13 : vector<8x32xf32>
      %c0_16 = arith.constant 0 : index
      %c0_17 = arith.constant 0 : index
      %22 = vector.load %arg9[%c0_16, %c0_17] : memref<8x32xf32, #tpu.memory_space<vmem>>, vector<8x32xf32>
      tpu.vector_store %arg9[%c0_16, %c0_17], %21 {strides = array<i32>} : memref<8x32xf32, #tpu.memory_space<vmem>>, vector<8x32xf32>,
    } else {
    }
    return
  }
  func.func @transform_0(%arg0: i32, %arg1: i32) -> (i32, i32) {
    %c0_i32 = arith.constant 0 : i32
    %c0_i32_0 = arith.constant 0 : i32
    return %arg0, %c0_i32 : i32, i32
  }
  func.func @transform_1(%arg0: i32, %arg1: i32) -> (i32, i32) {
    %c0_i32 = arith.constant 0 : i32
    %c0_i32_0 = arith.constant 0 : i32
    %c0_i32_1 = arith.constant 0 : i32
    return %c0_i32, %c0_i32_0 : i32, i32
  }
  func.func @transform_2(%arg0: i32, %arg1: i32) -> (i32, i32) {
    %c0_i32 = arith.constant 0 : i32
    %c0_i32_0 = arith.constant 0 : i32
    %c0_i32_1 = arith.constant 0 : i32
    return %c0_i32, %c0_i32_0 : i32, i32
  }
  func.func @transform_3(%arg0: i32, %arg1: i32) -> (i32, i32) {
    %c0_i32 = arith.constant 0 : i32
    %c0_i32_0 = arith.constant 0 : i32
    return %arg1, %c0_i32 : i32, i32
  }
  func.func @transform_4(%arg0: i32, %arg1: i32) -> (i32, i32) {
    %c0_i32 = arith.constant 0 : i32
    %c0_i32_0 = arith.constant 0 : i32
    return %c0_i32, %arg1 : i32, i32
  }
  func.func @transform_5(%arg0: i32, %arg1: i32) -> (i32, i32) {
    %c0_i32 = arith.constant 0 : i32
    %c0_i32_0 = arith.constant 0 : i32
    return %arg1, %c0_i32 : i32, i32
  }
  func.func @transform_6(%arg0: i32, %arg1: i32) -> (i32, i32) {
    %c0_i32 = arith.constant 0 : i32
    %c0_i32_0 = arith.constant 0 : i32
    %c0_i32_1 = arith.constant 0 : i32
    return %c0_i32, %c0_i32_0 : i32, i32
  }
  func.func @transform_7(%arg0: i32, %arg1: i32) -> (i32, i32) {
    %c0_i32 = arith.constant 0 : i32
    %c0_i32_0 = arith.constant 0 : i32
    return %arg0, %c0_i32 : i32, i32
  }
}

</mosaic_0001>

<bundles_post_ra>
// kernel: addnorm_ff.1
= control target key start
LH: loop header
LB: loop body
LE: loop exit
PB: predicated region body
PF: predicated region fallthrough
CT: control target
= control target key end

     0   :  { %12 = vsyncpa [#allocation4], 0  ;;  %s1261_s0 = inlined_call_operand.vmem [shape: f32[16,32], index: 0, kind: input, shape index: {}]   ;;  %s1262_s1 = inlined_call_operand.vmem [shape: f32[1,32], index: 1, kind: input, shape index: {}]   ;;  %s1263_s2 = inlined_call_operand.vmem [shape: f32[1,32], index: 2, kind: input, shape index: {}]   ;;  %s1264_s3 = inlined_call_operand.vmem [shape: bf16[128,32], index: 3, kind: input, shape index: {}]   ;;  %s1265_s4 = inlined_call_operand.vmem [shape: f32[1,128], index: 4, kind: input, shape index: {}]   ;;  %s1266_s5 = inlined_call_operand.vmem [shape: bf16[128,32], index: 5, kind: input, shape index: {}]   ;;  %s1267_s6 = inlined_call_operand.vmem [shape: f32[1,32], index: 6, kind: input, shape index: {}]   ;;  %s1268_s7 = inlined_call_operand.hbm [shape: f32[16,32], index: 7, kind: output, shape index: {}]  }
   0x1   :  { %14 = vsyncpa [#allocation4 + $0x1], 0  ;;  %s1055_s24 = smov 0   ;;  %s1057_s25 = smov 0  }
   0x2   :  { %s1059_s26 = smov 0   ;;  %s1061_s27 = smov 0  }
   0x3   :  { %s1063_s28 = smov 0   ;;  %s1065_s29 = smov 0  }
   0x4 LB: > { %s766_s30 = sadd.s32 4294967295, %s1010_s29   ;;  %s767_s8 = sadd.s32 4294967294, %s1010_s29   ;;  %s1010_s29 = sphi %s1065_s29, %s20_s29   ;;  %s1006_s28 = sphi %s1063_s28, %s1275_s28   ;;  %s1002_s27 = sphi %s1061_s27, %s1274_s27   ;;  %s998_s26 = sphi %s1059_s26, %s1273_s26   ;;  %s994_s25 = sphi %s1057_s25, %s1272_s25   ;;  %s990_s24 = sphi %s1055_s24, %s1271_s24  }
   0x5   : > { %s32_s9 = sadd.s32 1, %s1006_s28  ;;  %s206_s10 = sadd.s32 1, %s998_s26 }
   0x6   : > { %p34_p0 = scmp.ge.s32.totalorder %s32_s9, 2  ;;  %p216_p1 = scmp.ne.s32.totalorder %s998_s26, %s994_s25 }
   0x7   : > { %p217_p2 = scmp.eq.s32.totalorder %s766_s30, 1  ;;  %p222_p3 = scmp.ne.s32.totalorder %s994_s25, %s990_s24 }
   0x8   : > { %s1277_s9 = smov (%p34_p0, %s32_s9), 0  ;;  %p223_p5 = scmp.eq.s32.totalorder %s767_s8, 1 }
   0x9   : > { %p1095_p4 = por %p217_p2, %p216_p1  ;;  %s203_s12 = ssub.s32 %s1006_s28, %s1277_s9 }
   0xa   : > { %p773_p6 = scmp.ge.s32.totalorder %s1010_s29, 1  ;;  %p204_p7 = scmp.eq.s32.totalorder %s203_s12, 0 }
   0xb   : > { %p1102_p8 = por %p223_p5, %p222_p3  ;;  %p281_p9 = scmp.lt.s32.totalorder %s1010_s29, 3 }
   0xc   : > { %s1108_s14 = scalar_select %p204_p7, %s998_s26, %s206_s10  }
   0xd   : > { %p282_p10 = pnand %p773_p6, %p281_p9 }
   0xe   : > { %p325_p11 = scmp.lt.s32.totalorder (!%p282_p10), %s1002_s27, 1  ;;  %s798_s23 = sshll.u32 (!%p282_p10), %s1002_s27, 7 }
   0xf   : > { %285 = sbr.rel (%p282_p10) target bundleno = 751 (0x2ef), region = 48  ;;  %s1014_s17 = smov (!%p282_p10), [#allocation3]  }
  0x10   : > { %s938_s18 = sshll.u32 (!%p282_p10), %s1014_s17, 4  ;;  %s939_s18 = int_to_ptr.vmem [resolvable:$false] %s938_s18 }
  0x14   : > { %s326_s15 = scalar_select %p325_p11, %s1002_s27, 1  ;;  %vm350_vm0 = vcmask 261120   ;;  %v916_v2 = vld [vmem:[%s1264_s3 + $0x38] sm:$0xff]   ;;  %v1012_v3 = vmov 0.0   ;;  %v917_v5 = vld [vmem:[%s1264_s3 + $0x30] sm:$0xff]   ;;  %v918_v7 = vld [vmem:[%s1264_s3 + $0x28] sm:$0xff]  }
  0x15   : > { %819 = vmatprep.subr.bf16.mxu0 %v1012_v3  ;;  %839 = vmatprep.subr.bf16.mxu1 %v1012_v3  ;;  %v474_v4 = vsel %vm350_vm0, %v916_v2, 0  ;;  %v471_v6 = vsel %vm350_vm0, %v917_v5, 0  ;;  %v468_v8 = vsel %vm350_vm0, %v918_v7, 0  ;;  %v919_v9 = vld [vmem:[%s1264_s3 + $0x20] sm:$0xff]   ;;  %v920_v16 = vld [vmem:[%s1264_s3 + $0x18] sm:$0xff]   ;;  %v921_v18 = vld [vmem:[%s1264_s3 + $0x10] sm:$0xff]  }
  0x16   : > { %s775_s16 = sshll.u32 %s326_s15, 3  ;;  %820 = vmatpush3.bf16.xpose.msra.mxu0 %v474_v4  ;;  %v465_v10 = vsel %vm350_vm0, %v919_v9, 0  ;;  %v462_v17 = vsel %vm350_vm0, %v920_v16, 0  ;;  %v459_v19 = vsel %vm350_vm0, %v921_v18, 0  ;;  %v922_v20 = vld [vmem:[%s1264_s3 + $0x8] sm:$0xff]   ;;  %v923_v22 = vld [vmem:[%s1264_s3] sm:$0xff]   ;;  %s1214_s15 = scalar_lea.hbm %s1268_s7, %s798_s23 }
  0x17   : > { %s328_s19 = scalar_lea.vmem %s1261_s0, %s775_s16  ;;  %821 = vmatprep.subr.bf16.mxu0 %v1012_v3  ;;  %v456_v21 = vsel %vm350_vm0, %v922_v20, 0  ;;  %v453_v23 = vsel %vm350_vm0, %v923_v22, 0  ;;  %vm1013_vm1 = vmmov 0   ;;  %v924_v24 = vld [vmem:[%s1266_s5 + $0x38] sm:$0xff]   ;;  %v925_v25 = vld [vmem:[%s1266_s5 + $0x30] sm:$0xff]   ;;  %v926_v26 = vld [vmem:[%s1266_s5 + $0x28] sm:$0xff]  }
  0x18   : > { %v1115_v0 = vld [vmem:[%s328_s19] sm:$0xff]  ;;  %835 = vmatprep.mubr.msk.bf16.mxu0 %vm1013_vm1, %v1012_v3  ;;  %855 = vmatprep.mubr.msk.bf16.mxu1 %vm1013_vm1, %v1012_v3  ;;  %v928_v28 = vld [vmem:[%s1266_s5 + $0x18] sm:$0xff]   ;;  %v929_v29 = vld [vmem:[%s1266_s5 + $0x10] sm:$0xff]   ;;  %vm382_vm2 = vcmask 257024   ;;  %s322_s19 = sand.u32 1, %s994_s25  }
  0x19   : > { %v351_v1 = vsel %vm350_vm0, %v1115_v0, 0.0  ;;  %840 = vmatpush3.bf16.msra.mxu1 %v924_v24  ;;  %v927_v27 = vld [vmem:[%s1266_s5 + $0x20] sm:$0xff]   ;;  %v930_v41 = vld [vmem:[%s1266_s5 + $0x8] sm:$0xff]   ;;  %s774_s20 = sshll.u32 %s322_s19, 3  ;;  %s644_s16 = scalar_lea.sflag [#allocation4], %s322_s19 }
  0x1a   : > { %352 = vadd.xlane.f32.xlu0 %v351_v1  ;;  %841 = vmatprep.subr.bf16.mxu1 %v1012_v3  ;;  %v776_v34 = vld [vmem:[%s1262_s1] ss:$0 sm:$0xff]  ;;  %s324_s30 = scalar_lea.vmem [#allocation3], %s774_s20  ;;  %s940_s20 = scalar_lea.vmem %s939_s18, 256 }
  0x1b   : > { %v777_v36 = vld [vmem:[%s1263_s2] ss:$0 sm:$0xff]  ;;  %s657_s8 = sshll.u32 %s324_s30, 4  ;;  %s1216_s8 = int_to_ptr.vmem [resolvable:$true] %s657_s8 }
  0x1c   : > { %v931_v42 = vld [vmem:[%s1266_s5] sm:$0xff]   ;;  %s934_s27 = scalar_lea.vmem %s1216_s8, 128  ;;  %p941_p1 = scmp.lt.s32.totalorder %s1216_s8, %s939_s18 }
  0x1d   : > { %842 = vmatpush3.bf16.msra.mxu1 %v925_v25  ;;  %v778_v43 = vld [vmem:[%s1265_s4] ss:$0 sm:$0xff]  ;;  %p935_p12 = scmp.ne.s32.totalorder %s1216_s8, %s934_s27  ;;  %p942_p2 = scmp.lt.s32.totalorder %s940_s20, %s934_s27 }
  0x1e   : > { %822 = vmatpush3.bf16.xpose.msra.mxu0 %v471_v6  ;;  %843 = vmatprep.subr.bf16.mxu1 %v1012_v3  ;;  %v796_v51 = vld [vmem:[%s1267_s6] ss:$0 sm:$0xff] }
  0x1f   : > { %823 = vmatprep.subr.bf16.mxu0 %v1012_v3  ;;  %v633_v52 = vadd.f32 %v796_v51, %v1115_v0  ;;  %p936_p13 = pnand %p935_p12, %p1095_p4  ;;  %p943_p3 = por %p942_p2, %p941_p1 }
  0x21   : > { %844 = vmatpush3.bf16.msra.mxu1 %v926_v26  ;;  %p937_p0 = pneg %p936_p13 }
  0x22   : > { %845 = vmatprep.subr.bf16.mxu1 %v1012_v3 }
  0x23   : > { %p944_p5 = pnand %p943_p3, %p937_p0 }
  0x25   : > { %846 = vmatpush3.bf16.msra.mxu1 %v927_v27 }
  0x26   : > { %824 = vmatpush3.bf16.xpose.msra.mxu0 %v468_v8  ;;  %847 = vmatprep.subr.bf16.mxu1 %v1012_v3 }
  0x27   : > { %825 = vmatprep.subr.bf16.mxu0 %v1012_v3 }
  0x29   : > { %848 = vmatpush3.bf16.msra.mxu1 %v928_v28 }
  0x2a   : > { %849 = vmatprep.subr.bf16.mxu1 %v1012_v3 }
  0x2d   : > { %850 = vmatpush3.bf16.msra.mxu1 %v929_v29 }
  0x2e   : > { %826 = vmatpush3.bf16.xpose.msra.mxu0 %v465_v10  ;;  %851 = vmatprep.subr.bf16.mxu1 %v1012_v3 }
  0x2f   : > { %827 = vmatprep.subr.bf16.mxu0 %v1012_v3 }
  0x31   : > { %852 = vmatpush3.bf16.msra.mxu1 %v930_v41 }
  0x32   : > { %853 = vmatprep.subr.bf16.mxu1 %v1012_v3 }
  0x35   : > { %854 = vmatpush3.bf16.msra.mxu1 %v931_v42 }
  0x36   : > { %828 = vmatpush3.bf16.xpose.msra.mxu0 %v462_v17 }
  0x37   : > { %829 = vmatprep.subr.bf16.mxu0 %v1012_v3 }
  0x3e   : > { %830 = vmatpush3.bf16.xpose.msra.mxu0 %v459_v19 }
  0x3f   : > { %831 = vmatprep.subr.bf16.mxu0 %v1012_v3 }
  0x46   : > { %832 = vmatpush3.bf16.xpose.msra.mxu0 %v456_v21 }
  0x47   : > { %833 = vmatprep.subr.bf16.mxu0 %v1012_v3 }
  0x4e   : > { %834 = vmatpush3.bf16.xpose.msra.mxu0 %v453_v23 }
  0xa3   : > { %v353_v11 = vpop.xlane.xlu0 %352 }
  0xa4   : > { %v355_v12 = vmul.f32 0.03125, %v353_v11 }
  0xa6   : > { %v356_v13 = vsub.f32 %v1115_v0, %v355_v12 }
  0xa8   : > { %v357_v14 = vmul.f32 %v356_v13, %v356_v13 }
  0xaa   : > { %v358_v15 = vsel %vm350_vm0, %v357_v14, 0.0 }
  0xab   : > { %359 = vadd.xlane.f32.xlu0 %v358_v15 }
 0x134   : > { %v360_v30 = vpop.xlane.xlu0 %359 }
 0x135   : > { %v361_v31 = vmul.f32 0.03125, %v360_v30 }
 0x137   : > { %v362_v32 = vadd.f32 1e-05, %v361_v31 }
 0x139   : > { %932 = vrsqrt.f32 %v362_v32 }
 0x146   : > { %v933_v33 = vpop.eup %932 }
 0x147   : > { %v364_v35 = vmul.f32 %v933_v33, %v356_v13 }
 0x149   : > { %v372_v37 = vmul.f32 %v776_v34, %v364_v35 }
 0x14b   : > { %v380_v38 = vadd.f32 %v777_v36, %v372_v37 }
 0x14d   : > { %v381_v39 = vpack.c.bf16 %v380_v38, %v380_v38 }
 0x14f   : > { %383 = vst.msk [vmem:[#allocation2] sm:$0xf] %vm382_vm2, %v381_v39 }
 0x156   : > { %v400_v40 = vld [vmem:[#allocation2] sm:$0xf] }
 0x157   : > { %836 = vmatmul.mubr.msk.bf16.vlgmr.msra.gmra.mxu0 %vm350_vm0, %v400_v40 }
 0x217   : > { %v510_v44 = vpop.f32.mrf.mxu0 }
 0x218   : > { %v511_v45 = vadd.f32 %v778_v43, %v510_v44 }
 0x219   : > { %v837_v46 = vpop.f32.mrf.mxu0 }
 0x21a   : > { %v516_v47 = vmax.f32 %v511_v45, 0.0 }
 0x21b   : > { %v513_v48 = vpop.f32.mrf.mxu0 }
 0x21c   : > { %v533_v49 = vpack.c.bf16 %v516_v47, %v516_v47 }
 0x21d   : > { %v838_v50 = vpop.f32.mrf.mxu0 }
 0x21e   : > { %856 = vmatmul.mubr.bf16.vlgmr.msra.gmra.mxu1 %v533_v49 }
 0x2de   : > { %v616_v53 = vpop.f32.mrf.mxu1 }
 0x2df   : > { %v634_v54 = vadd.f32 %v633_v52, %v616_v53 }
 0x2e0   : > { %v857_v55 = vpop.f32.mrf.mxu1 }
 0x2e1   : > { %635 = vst.msk [vmem:[%s324_s30] sm:$0xff] %vm350_vm0, %v634_v54 }
 0x2e2   : > { %v619_v56 = vpop.f32.mrf.mxu1 }
 0x2e3   : > { %947 = shalt.err (!%p944_p5)
}
 0x2e4   : > { %s948_s21 = scalar_lea.hbm %s1214_s15, 128  ;;  %s952_s23 = scalar_lea.hbm %s1268_s7, 256 }
 0x2e5   : > { %p949_p6 = scmp.ne.s32.totalorder %s1214_s15, %s948_s21  ;;  %p953_p10 = scmp.lt.s32.totalorder %s1214_s15, %s1268_s7 }
 0x2e6   : > { %p954_p11 = scmp.lt.s32.totalorder %s952_s23, %s948_s21 }
 0x2e7   : > { %p950_p7 = pnand %p949_p6, %p1095_p4 }
 0x2e8   : > { %p955_p12 = por %p954_p11, %p953_p10 }
 0x2e9   : > { %p951_p9 = pneg %p950_p7 }
 0x2eb   : > { %p956_p13 = pnand %p955_p12, %p951_p9 }
 0x2ed   : > { %959 = shalt.err (!%p956_p13)
}
 0x2ee   : > { %859 = dma.vmem_to_hbm [thread:$0]  (%p1095_p4), %s1216_s8, 128, %s1214_s15, %s644_s16   ;;  %v858_v57 = vpop.f32.mrf.mxu1 }
 0x2ef PF: > { %p865_p0 = scmp.ge.s32.totalorder %s1010_s29, 2  ;;  %s669_s12 = sand.u32 1, %s990_s24  }
 0x2f0   : > { %s670_s27 = scalar_lea.sflag [#allocation4], %s669_s12 }
 0x2f1   : > { %p862_p1 = pnand %p865_p0, %p1102_p8 }
 0x2f3   : > { %p863_p2 = pneg %p862_p1 }
 0x2f5   : > { %985 = dma.done.wait (%p863_p2), %s670_s27, 128  }
 0x2f6   : > { %987 = vsyncadd (%p863_p2), %s670_s27, 4294967168  ;;  %s20_s29 = sadd.s32 1, %s1010_s29   ;;  %s1271_s24 = smov %s994_s25 }
 0x2f7   : > { %p17_p3 = scmp.ge.s32.totalorder %s20_s29, 4   ;;  %s1272_s25 = smov %s998_s26 }
 0x2f8   : > { %s1273_s26 = smov %s1108_s14  ;;  %s1274_s27 = smov %s1006_s28 }
 0x2f9   : > { %s1275_s28 = smov %s1277_s9  ;;  %19 = sbr.rel (!%p17_p3) target bundleno = 4 (0x4), region = 104 }
 0x2fe   :  { %675 = vsyncpa [#allocation4], 1 }
 0x2ff   :  { %677 = vsyncpa [#allocation4 + $0x1], 1 }

</bundles_post_ra>
